<compile_context>
chip_gen: v7x
topology: tpu7x:2x2x1
jax: 0.10.0
libtpu: 0.0.40
codegen_flags: <defaults>
</compile_context>

<pallas_src>
import functools
import math

import jax
import jax.numpy as jnp
from jax.experimental import pallas as pl
from jax.experimental.pallas import tpu as pltpu

NBITS = 8
LANE = 128        # TPU lane width
SUBLANE = 8
MAX_TM = 512      # rows per block: 512*128*4B = 256 KiB f32 tile (near roofline)
NCORES = 2        # stats-pass megacore split (v7x); runs sequentially on 1-TC chips


def _round_up(v, m):
    return (v + m - 1) // m * m


def _stats_kernel(x_ref, min_ref, abs_ref, min_sc, abs_sc):
    """Per-core partial min(x) and sum(|x|) with vreg-shaped accumulators."""
    i = pl.program_id(1)

    @pl.when(i == 0)
    def _():
        min_sc[...] = jnp.full_like(min_sc, jnp.inf)
        abs_sc[...] = jnp.zeros_like(abs_sc)

    x = x_ref[...].astype(jnp.float32)
    min_sc[...] = jnp.minimum(min_sc[...], x)      # pure VPU in the hot loop
    abs_sc[...] = abs_sc[...] + jnp.abs(x)

    @pl.when(i == pl.num_programs(1) - 1)
    def _():
        # Cross-lane (XLU) reduction only once, in the epilogue.  Each core
        # writes its scalar partials broadcast over its own (8, 128) out block.
        min_ref[...] = jnp.broadcast_to(jnp.min(min_sc[...]), min_ref.shape)
        abs_ref[...] = jnp.broadcast_to(jnp.sum(abs_sc[...]), abs_ref.shape)


def _quant_kernel(min_ref, abs_ref, x_ref, o_ref, *, ncores, inv_n,
                  qn_s, qp_s, qn_u, qp_u, rs_s, rs_u):
    """Elementwise fake-quant: round(clip(x * (1/alpha), Qn, Qp)) * alpha."""
    # Combine per-core partials (scalar reads from SMEM; core c's value sits at
    # row c*8, col 0 of the broadcast partial blocks).
    xmin = min_ref[0, 0]
    asum = abs_ref[0, 0]
    for c in range(1, ncores):
        xmin = jnp.minimum(xmin, min_ref[c * SUBLANE, 0])
        asum = asum + abs_ref[c * SUBLANE, 0]

    signed = xmin < jnp.float32(-1e-5)
    qn = jnp.where(signed, qn_s, qn_u)
    qp = jnp.where(signed, qp_s, qp_u)
    # alpha = 2 * mean(|x|) / sqrt(Qp); 1/sqrt(Qp) folded to compile-time consts.
    alpha = jnp.float32(2.0) * (asum * inv_n) * jnp.where(signed, rs_s, rs_u)
    # TODO(synk): alpha == 0 (all-zero input) yields NaN, same as the PyTorch module.
    inv_alpha = jnp.float32(1.0) / alpha

    x = x_ref[...].astype(jnp.float32)
    xq = jnp.round(jnp.clip(x * inv_alpha, qn, qp))
    o_ref[...] = (xq * alpha).astype(o_ref.dtype)


def act_lsq_forward(x, nbits=NBITS):
    orig_shape = x.shape
    orig_dtype = x.dtype
    n = x.size

    # Flatten to a lane-dense 2D view; pad tail with zeros.  Zero padding does
    # not change the sign test (0 > -1e-5) nor sum(|x|), and padded outputs are
    # sliced off at the end.  abs-mean divides by the *real* element count.
    rows = pl.cdiv(n, LANE)
    rows_pc = pl.cdiv(rows, NCORES)                       # rows per core
    tm = min(MAX_TM, _round_up(rows_pc, SUBLANE))         # block rows
    blocks_pc = pl.cdiv(rows_pc, tm)                      # blocks per core
    rows_pad = NCORES * blocks_pc * tm
    n_pad = rows_pad * LANE

    flat = x.reshape(-1)
    if n_pad != n:
        flat = jnp.pad(flat, (0, n_pad - n))
    x2d = flat.reshape(rows_pad, LANE)

    # --- pass 1: per-core partial min and sum(|x|) ---
    xmin_p, abssum_p = pl.pallas_call(
        _stats_kernel,
        out_shape=(jax.ShapeDtypeStruct((NCORES * SUBLANE, LANE), jnp.float32),
                   jax.ShapeDtypeStruct((NCORES * SUBLANE, LANE), jnp.float32)),
        grid_spec=pltpu.PrefetchScalarGridSpec(
            num_scalar_prefetch=0,
            grid=(NCORES, blocks_pc),
            in_specs=[pl.BlockSpec((tm, LANE),
                                   lambda c, i: (c * blocks_pc + i, 0))],
            out_specs=[pl.BlockSpec((SUBLANE, LANE), lambda c, i: (c, 0)),
                       pl.BlockSpec((SUBLANE, LANE), lambda c, i: (c, 0))],
            scratch_shapes=[pltpu.VMEM((tm, LANE), jnp.float32),
                            pltpu.VMEM((tm, LANE), jnp.float32)]),
        compiler_params=pltpu.CompilerParams(
            dimension_semantics=("parallel", "arbitrary")),
    )(x2d)

    qp_s = float(2 ** (nbits - 1) - 1)
    qn_s = float(-(2 ** (nbits - 1)))
    qp_u = float(2 ** nbits - 1)
    qn_u = 0.0
    quant = functools.partial(
        _quant_kernel, ncores=NCORES, inv_n=1.0 / float(n),
        qn_s=qn_s, qp_s=qp_s, qn_u=qn_u, qp_u=qp_u,
        rs_s=1.0 / math.sqrt(qp_s), rs_u=1.0 / math.sqrt(qp_u))

    # --- pass 2: elementwise quantize-dequantize (alpha derived in-kernel) ---
    out2d = pl.pallas_call(
        quant,
        out_shape=jax.ShapeDtypeStruct((rows_pad, LANE), orig_dtype),
        grid_spec=pltpu.PrefetchScalarGridSpec(
            num_scalar_prefetch=0,
            grid=(NCORES * blocks_pc,),
            in_specs=[pl.BlockSpec(memory_space=pltpu.MemorySpace.SMEM),
                      pl.BlockSpec(memory_space=pltpu.MemorySpace.SMEM),
                      pl.BlockSpec((tm, LANE), lambda i: (i, 0))],
            out_specs=pl.BlockSpec((tm, LANE), lambda i: (i, 0))),
        compiler_params=pltpu.CompilerParams(
            dimension_semantics=("parallel",)),
    )(xmin_p, abssum_p, x2d)

    return out2d.reshape(-1)[:n].reshape(orig_shape)


def _reference(x, nbits=NBITS):
    """Pure-JAX reference mirroring the PyTorch forward."""
    xmin = jnp.min(x)
    signed = xmin < -1e-5
    qp = jnp.where(signed, 2.0 ** (nbits - 1) - 1, 2.0 ** nbits - 1)
    qn = jnp.where(signed, -(2.0 ** (nbits - 1)), 0.0)
    alpha = 2.0 * jnp.mean(jnp.abs(x)) / jnp.sqrt(qp)
    return jnp.round(jnp.clip(x / alpha, qn, qp)) * alpha


if __name__ == "__main__":
    key = jax.random.PRNGKey(0)
    # NCHW activation, e.g. output of a small conv layer.
    x = jax.random.normal(key, (2, 4, 16, 16), dtype=jnp.float32)

    out = act_lsq_forward(x)
    out = jax.block_until_ready(out)

    ref = _reference(x)
    assert out.shape == x.shape and out.dtype == x.dtype

    # alpha comes from an f32 sum whose accumulation order differs between the
    # kernel and XLA's reference reduction; at exact round-to-nearest ties this
    # can flip one quantization step.  Allow that; require everything else exact.
    xmin_ref = jnp.min(x)
    qp_ref = jnp.where(xmin_ref < -1e-5, 2.0 ** (NBITS - 1) - 1, 2.0 ** NBITS - 1)
    alpha_ref = 2.0 * jnp.mean(jnp.abs(x)) / jnp.sqrt(qp_ref)
    err = jnp.abs(out - ref)
    assert float(jnp.max(err)) <= float(alpha_ref) * 1.001 + 1e-6, "mismatch vs reference"
    assert float(jnp.mean((err <= 1e-5).astype(jnp.float32))) >= 0.99, "mismatch vs reference"

    print("KERNEL_OK")
</pallas_src>

<mosaic_0001>
module attributes {stable_mosaic.version = 11 : i64} {
  func.func @_stats_kernel(%arg0: i32, %arg1: i32, %arg2: memref<8x128xf32, #tpu.memory_space<vmem>>, %arg3: memref<8x128xf32, #tpu.memory_space<vmem>>, %arg4: memref<8x128xf32, #tpu.memory_space<vmem>>, %arg5: memref<8x128xf32, #tpu.memory_space<vmem>>, %arg6: memref<8x128xf32, #tpu.memory_space<vmem>>) attributes {dimension_semantics = [#tpu.dimension_semantics<parallel>, #tpu.dimension_semantics<arbitrary>], iteration_bounds = array<i64: 2, 1>, scalar_prefetch = 0 : i64, scratch_operands = 2 : i64, tpu.core_type = #tpu.core_type<tc>, window_params = [{transform_indices = @transform_0, window_bounds = array<i64: 8, 128>}, {transform_indices = @transform_1, window_bounds = array<i64: 8, 128>}, {transform_indices = @transform_2, window_bounds = array<i64: 8, 128>}]} {
    %c0_i32 = arith.constant 0 : i32
    %0 = arith.cmpi eq, %arg1, %c0_i32 : i32
    %1 = arith.extui %0 : i1 to i32
    %c0_i32_0 = arith.constant 0 : i32
    %2 = arith.cmpi ne, %1, %c0_i32_0 : i32
    scf.if %2 {
      %cst = arith.constant 0x7F800000 : f32
      %14 = vector.broadcast %cst : f32 to vector<8x128xf32>
      %c0_12 = arith.constant 0 : index
      %c0_13 = arith.constant 0 : index
      %15 = vector.load %arg5[%c0_12, %c0_13] : memref<8x128xf32, #tpu.memory_space<vmem>>, vector<8x128xf32>
      tpu.vector_store %arg5[%c0_12, %c0_13], %14 {strides = array<i32>} : memref<8x128xf32, #tpu.memory_space<vmem>>, vector<8x128xf32>,
      %cst_14 = arith.constant 0.000000e+00 : f32
      %16 = vector.broadcast %cst_14 : f32 to vector<8x128xf32>
      %c0_15 = arith.constant 0 : index
      %c0_16 = arith.constant 0 : index
      %17 = vector.load %arg6[%c0_15, %c0_16] : memref<8x128xf32, #tpu.memory_space<vmem>>, vector<8x128xf32>
      tpu.vector_store %arg6[%c0_15, %c0_16], %16 {strides = array<i32>} : memref<8x128xf32, #tpu.memory_space<vmem>>, vector<8x128xf32>,
    } else {
    }
    %c0 = arith.constant 0 : index
    %c0_1 = arith.constant 0 : index
    %3 = vector.load %arg2[%c0, %c0_1] : memref<8x128xf32, #tpu.memory_space<vmem>>, vector<8x128xf32>
    %c0_2 = arith.constant 0 : index
    %c0_3 = arith.constant 0 : index
    %4 = vector.load %arg5[%c0_2, %c0_3] : memref<8x128xf32, #tpu.memory_space<vmem>>, vector<8x128xf32>
    %5 = arith.minimumf %4, %3 : vector<8x128xf32>
    %c0_4 = arith.constant 0 : index
    %c0_5 = arith.constant 0 : index
    %6 = vector.load %arg5[%c0_4, %c0_5] : memref<8x128xf32, #tpu.memory_space<vmem>>, vector<8x128xf32>
    tpu.vector_store %arg5[%c0_4, %c0_5], %5 {strides = array<i32>} : memref<8x128xf32, #tpu.memory_space<vmem>>, vector<8x128xf32>,
    %c0_6 = arith.constant 0 : index
    %c0_7 = arith.constant 0 : index
    %7 = vector.load %arg6[%c0_6, %c0_7] : memref<8x128xf32, #tpu.memory_space<vmem>>, vector<8x128xf32>
    %8 = math.absf %3 : vector<8x128xf32>
    %9 = arith.addf %7, %8 : vector<8x128xf32>
    %c0_8 = arith.constant 0 : index
    %c0_9 = arith.constant 0 : index
    %10 = vector.load %arg6[%c0_8, %c0_9] : memref<8x128xf32, #tpu.memory_space<vmem>>, vector<8x128xf32>
    tpu.vector_store %arg6[%c0_8, %c0_9], %9 {strides = array<i32>} : memref<8x128xf32, #tpu.memory_space<vmem>>, vector<8x128xf32>,
    %c0_i32_10 = arith.constant 0 : i32
    %11 = arith.cmpi eq, %arg1, %c0_i32_10 : i32
    %12 = arith.extui %11 : i1 to i32
    %c0_i32_11 = arith.constant 0 : i32
    %13 = arith.cmpi ne, %12, %c0_i32_11 : i32
    scf.if %13 {
      %c0_12 = arith.constant 0 : index
      %c0_13 = arith.constant 0 : index
      %14 = vector.load %arg5[%c0_12, %c0_13] : memref<8x128xf32, #tpu.memory_space<vmem>>, vector<8x128xf32>
      %15 = vector.shape_cast %14 : vector<8x128xf32> to vector<1x8x128xf32>
      %cst = arith.constant dense<0x7F800000> : vector<1xf32>
      %16 = vector.multi_reduction <minimumf>, %15, %cst [1, 2] : vector<1x8x128xf32> to vector<1xf32>
      %17 = vector.shape_cast %16 : vector<1xf32> to vector<1x1x1xf32>
      %18 = vector.extract %17[0, 0, 0] : f32 from vector<1x1x1xf32>
      %19 = vector.broadcast %18 : f32 to vector<8x128xf32>
      %c0_14 = arith.constant 0 : index
      %c0_15 = arith.constant 0 : index
      %20 = vector.load %arg3[%c0_14, %c0_15] : memref<8x128xf32, #tpu.memory_space<vmem>>, vector<8x128xf32>
      tpu.vector_store %arg3[%c0_14, %c0_15], %19 {strides = array<i32>} : memref<8x128xf32, #tpu.memory_space<vmem>>, vector<8x128xf32>,
      %c0_16 = arith.constant 0 : index
      %c0_17 = arith.constant 0 : index
      %21 = vector.load %arg6[%c0_16, %c0_17] : memref<8x128xf32, #tpu.memory_space<vmem>>, vector<8x128xf32>
      %22 = vector.shape_cast %21 : vector<8x128xf32> to vector<1x8x128xf32>
      %cst_18 = arith.constant dense<0.000000e+00> : vector<1xf32>
      %23 = vector.multi_reduction <add>, %22, %cst_18 [1, 2] : vector<1x8x128xf32> to vector<1xf32>
      %24 = vector.shape_cast %23 : vector<1xf32> to vector<1x1x1xf32>
      %25 = vector.extract %24[0, 0, 0] : f32 from vector<1x1x1xf32>
      %26 = vector.broadcast %25 : f32 to vector<8x128xf32>
      %c0_19 = arith.constant 0 : index
      %c0_20 = arith.constant 0 : index
      %27 = vector.load %arg4[%c0_19, %c0_20] : memref<8x128xf32, #tpu.memory_space<vmem>>, vector<8x128xf32>
      tpu.vector_store %arg4[%c0_19, %c0_20], %26 {strides = array<i32>} : memref<8x128xf32, #tpu.memory_space<vmem>>, vector<8x128xf32>,
    } else {
    }
    return
  }
  func.func @transform_0(%arg0: i32, %arg1: i32) -> (i32, i32) {
    %c1_i32 = arith.constant 1 : i32
    %0 = arith.muli %arg0, %c1_i32 : i32
    %1 = arith.addi %0, %arg1 : i32
    %c0_i32 = arith.constant 0 : i32
    %c0_i32_0 = arith.constant 0 : i32
    return %1, %c0_i32 : i32, i32
  }
  func.func @transform_1(%arg0: i32, %arg1: i32) -> (i32, i32) {
    %c0_i32 = arith.constant 0 : i32
    %c0_i32_0 = arith.constant 0 : i32
    return %arg0, %c0_i32 : i32, i32
  }
  func.func @transform_2(%arg0: i32, %arg1: i32) -> (i32, i32) {
    %c0_i32 = arith.constant 0 : i32
    %c0_i32_0 = arith.constant 0 : i32
    return %arg0, %c0_i32 : i32, i32
  }
}

</mosaic_0001>

<bundles_post_ra>
// kernel: tpu_custom_call.1
= control target key start
LH: loop header
LB: loop body
LE: loop exit
PB: predicated region body
PF: predicated region fallthrough
CT: control target
= control target key end

     0   :  { %8 = vsyncpa [#allocation5], 0  ;;  %s835_s0 = inlined_call_operand.hbm [shape: f32[16,128], index: 0, kind: input, shape index: {}]   ;;  %s836_s1 = inlined_call_operand.hbm [shape: f32[16,128], index: 1, kind: output, shape index: {0}]   ;;  %s837_s2 = inlined_call_operand.hbm [shape: f32[16,128], index: 2, kind: output, shape index: {1}]  }
   0x1   :  { %10 = vsyncpa [#allocation5 + $0x1], 0 }
   0x2   :  { %11 = vsyncpa [#allocation6], 0 }
   0x3   :  { %13 = vsyncpa [#allocation6 + $0x1], 0 }
   0x4   :  { %14 = vsyncpa [#allocation9], 0 }
   0x5   :  { %16 = vsyncpa [#allocation9 + $0x1], 0  ;;  %s621_s9 = smov 0   ;;  %s623_s10 = smov 0  }
   0x6   :  { %s625_s11 = smov 0   ;;  %s627_s12 = smov 0  }
   0x7   :  { %s629_s13 = smov 0   ;;  %s631_s14 = smov 0  }
   0x8 LB: > { %s370_s15 = sadd.s32 4294967295, %s601_s14   ;;  %s371_s16 = sadd.s32 4294967294, %s601_s14   ;;  %s601_s14 = sphi %s631_s14, %s22_s14   ;;  %s597_s13 = sphi %s629_s13, %s853_s13   ;;  %s593_s12 = sphi %s627_s12, %s852_s12   ;;  %s589_s11 = sphi %s625_s11, %s851_s11   ;;  %s585_s10 = sphi %s623_s10, %s850_s10   ;;  %s581_s9 = sphi %s621_s9, %s849_s9  }
   0x9   : > { %s34_s17 = sadd.s32 1, %s597_s13  ;;  %s43_s18 = sadd.s32 1, %s589_s11 }
   0xa   : > { %p36_p0 = scmp.ge.s32.totalorder %s34_s17, 2  ;;  %p50_p1 = scmp.ne.s32.totalorder %s589_s11, %s585_s10 }
   0xb   : > { %p51_p2 = scmp.eq.s32.totalorder %s601_s14, 0  ;;  %p56_p3 = scmp.ne.s32.totalorder %s585_s10, %s581_s9 }
   0xc   : > { %s855_s17 = smov (%p36_p0, %s34_s17), 0  ;;  %p57_p5 = scmp.eq.s32.totalorder %s370_s15, 0 }
   0xd   : > { %p662_p4 = por %p51_p2, %p50_p1  ;;  %s40_s20 = ssub.s32 %s597_s13, %s855_s17 }
   0xe   : > { %p80_p6 = scmp.eq.s32.totalorder %s370_s15, 1  ;;  %p41_p7 = scmp.eq.s32.totalorder %s40_s20, 0 }
   0xf   : > { %p668_p8 = por %p57_p5, %p56_p3  ;;  %p86_p10 = scmp.eq.s32.totalorder %s371_s16, 1 }
  0x10   : > { %p672_p9 = por %p80_p6, %p50_p1  ;;  %p407_p13 = scmp.lt.s32.totalorder %s601_s14, 2 }
  0x11   : > { %s677_s23 = scalar_select %p41_p7, %s589_s11, %s43_s18  }
  0x12   : > { %s841_s22 = scalar_select %p672_p9, 1, 0 }
  0x13   : > { %p679_p11 = por %p86_p10, %p56_p3  ;;  %s132_s25 = sand.u32 1, %s589_s11  }
  0x14   : > { %s374_s26 = sshll.u32 %s132_s25, 3  ;;  %s375_s27 = sshll.u32 %s597_s13, 7 }
  0x15   : > { %s842_s24 = scalar_select %p679_p11, 1, 0 }
  0x16   : > { %s690_s30 = scalar_lea.hbm %s835_s0, %s375_s27  ;;  %s136_s3 = scalar_lea.vmem [#allocation4], %s374_s26 }
  0x17   : > { %s144_s4 = sshll.u32 %s136_s3, 4  ;;  %p696_p0 = pnand %p407_p13, %p662_p4  ;;  %s692_s4 = int_to_ptr.vmem [resolvable:$true] %s144_s4 }
  0x18   : > { %s133_s6 = scalar_lea.sflag [#allocation5], %s132_s25  ;;  %s457_s7 = scalar_lea.hbm %s690_s30, 128 }
  0x19   : > { %p458_p3 = scmp.ne.s32.totalorder %s690_s30, %s457_s7  ;;  %p459_p5 = pneg %p696_p0 }
  0x1a   : > { %s462_s16 = scalar_lea.hbm %s835_s0, 256  ;;  %p463_p4 = scmp.lt.u32.totalorder %s690_s30, %s835_s0 }
  0x1b   : > { %p460_p6 = pnand %p459_p5, %p458_p3  ;;  %p464_p10 = scmp.lt.u32.totalorder %s462_s16, %s457_s7 }
  0x1c   : > { %p466_p12 = scmp.lt.u32.totalorder %s457_s7, %s690_s30 }
  0x1d   : > { %p461_p7 = pneg %p460_p6  ;;  %p465_p13 = por %p464_p10, %p463_p4 }
  0x1f   : > { %p467_p1 = por %p466_p12, %p465_p13 }
  0x21   : > { %p468_p2 = pnand %p467_p1, %p461_p7 }
  0x23   : > { %471 = shalt.err (!%p468_p2)
}
  0x24   : > { %s472_s20 = scalar_lea.vmem %s692_s4, 128  ;;  %s603_s25 = smov [#allocation4]  }
  0x25   : > { %p473_p3 = scmp.ne.s32.totalorder %s692_s4, %s472_s20  ;;  %s477_s26 = sshll.u32 %s603_s25, 4  ;;  %s478_s26 = int_to_ptr.vmem [resolvable:$false] %s477_s26 }
  0x26   : > { %s479_s27 = scalar_lea.vmem %s478_s26, 256  ;;  %p480_p9 = scmp.lt.s32.totalorder %s692_s4, %s478_s26 }
  0x27   : > { %p475_p6 = pnand %p473_p3, %p459_p5  ;;  %p481_p4 = scmp.lt.s32.totalorder %s479_s27, %s472_s20 }
  0x29   : > { %p476_p11 = pneg %p475_p6  ;;  %p482_p10 = por %p481_p4, %p480_p9 }
  0x2b   : > { %p483_p12 = pnand %p482_p10, %p476_p11 }
  0x2d   : > { %486 = shalt.err (!%p483_p12)
}
  0x2e   : > { %399 = dma.hbm_to_vmem [thread:$0]  (!%p696_p0), %s690_s30, 128, %s692_s4, %s133_s6  }
  0x2f   : > { %p844_p1 = scmp.lt.s32.totalorder %s601_s14, 3  ;;  %p845_p2 = scmp.ge.s32.totalorder %s601_s14, 1 }
  0x31   : > { %p150_p5 = pnand %p845_p2, %p844_p1 }
  0x32   : > { %s732_s28 = sand.u32 (!%p150_p5), 1, %s585_s10  }
  0x33   : > { %153 = sbr.rel (%p150_p5) target bundleno = 303 (0x12f), region = 24  ;;  %s735_s29 = sshll.u32 (!%p150_p5), %s732_s28, 3 }
  0x34   : > { %s156_s3 = scalar_lea.sflag (!%p150_p5), [#allocation5], %s732_s28  ;;  %s159_s5 = scalar_lea.vmem (!%p150_p5), [#allocation4], %s735_s29 }
  0x3a   : > { %568 = dma.done.wait (%p668_p8), %s156_s3, 128  }
  0x3b   : > { %570 = vsyncadd (%p668_p8), %s156_s3, 4294967168  ;;  %v192_v0 = vld [vmem:[%s159_s5] sm:$0xff]  ;;  %s382_s21 = sshll.u32 %s593_s12, 7  ;;  %s177_s30 = scalar_lea.vmem [#allocation7], %s735_s29 }
  0x3c   : > { %204 = vmin.xlane.f32.xlu0 %v192_v0  ;;  %v197_v1 = vand.u32 2147483647, %v192_v0  ;;  %s246_s4 = sshll.u32 %s177_s30, 4  ;;  %s184_s6 = scalar_lea.vmem [#allocation8], %s735_s29  ;;  %s755_s4 = int_to_ptr.vmem [resolvable:$true] %s246_s4 }
  0x3d   : > { %s259_s7 = sshll.u32 %s184_s6, 4  ;;  %s753_s16 = scalar_lea.hbm %s836_s1, %s382_s21  ;;  %s757_s7 = int_to_ptr.vmem [resolvable:$true] %s259_s7 }
  0x3e   : > { %s228_s19 = scalar_lea.sflag [#allocation6], %s732_s28  ;;  %s487_s20 = scalar_lea.vmem %s755_s4, 128 }
  0x3f   : > { %p488_p8 = scmp.ne.s32.totalorder %s755_s4, %s487_s20  ;;  %p846_p9 = scmp.ne.s32.totalorder %s841_s22, 0 }
  0x40   : > { %216 = vadd.xlane.f32.xlu0 %v197_v1  ;;  %s604_s25 = smov [#allocation7]  }
  0x41   : > { %p489_p11 = pnand %p488_p8, %p846_p9  ;;  %s491_s26 = sshll.u32 %s604_s25, 4  ;;  %s492_s26 = int_to_ptr.vmem [resolvable:$false] %s491_s26 }
  0x42   : > { %s493_s27 = scalar_lea.vmem %s492_s26, 256  ;;  %p494_p7 = scmp.lt.s32.totalorder %s755_s4, %s492_s26 }
  0x43   : > { %p490_p0 = pneg %p489_p11  ;;  %p495_p13 = scmp.lt.s32.totalorder %s493_s27, %s487_s20 }
  0x45   : > { %p496_p3 = por %p495_p13, %p494_p7 }
  0x47   : > { %p497_p6 = pnand %p496_p3, %p490_p0 }
  0xc9   : > { %v205_v2 = vpop.xlane.xlu0 %204 }
  0xca   : > { %v206_v3 = vrot.slane %v205_v2, 4 }
  0xcc   : > { %v207_v4 = vmin.f32 %v205_v2, %v206_v3 }
  0xcd   : > { %v217_v5 = vpop.xlane.xlu0 %216 }
  0xce   : > { %v208_v6 = vrot.slane %v207_v4, 2  ;;  %v218_v7 = vrot.slane %v217_v5, 4 }
  0xd0   : > { %v219_v8 = vadd.f32 %v218_v7, %v217_v5  ;;  %v209_v9 = vmin.f32 %v207_v4, %v208_v6 }
  0xd2   : > { %v220_v10 = vrot.slane %v219_v8, 2  ;;  %v210_v11 = vrot.slane %v209_v9, 1 }
  0xd4   : > { %v221_v12 = vadd.f32 %v220_v10, %v219_v8  ;;  %v211_v13 = vmin.f32 %v209_v9, %v210_v11 }
  0xd6   : > { %386 = vpush %v211_v13  ;;  %v222_v14 = vrot.slane %v221_v12, 1 }
  0xd8   : > { %v223_v15 = vadd.f32 %v222_v14, %v221_v12 }
  0xda   : > { %388 = vpush %v223_v15 }
 0x107   : > { %s387_s18 = spop %386 }
 0x108   : > { %v213_v16 = vstv %s387_s18 }
 0x109   : > { %214 = vst [vmem:[%s177_s30] sm:$0xff] %v213_v16 }
 0x10a   : > { %500 = shalt.err (!%p497_p6)
}
 0x10b   : > { %s501_s3 = scalar_lea.hbm %s753_s16, 128  ;;  %s505_s8 = scalar_lea.hbm %s836_s1, 256 }
 0x10c   : > { %p502_p4 = scmp.ne.s32.totalorder %s753_s16, %s501_s3  ;;  %p506_p1 = scmp.lt.u32.totalorder %s753_s16, %s836_s1 }
 0x10d   : > { %p507_p2 = scmp.lt.u32.totalorder %s505_s8, %s501_s3  ;;  %p509_p8 = scmp.lt.u32.totalorder %s501_s3, %s753_s16 }
 0x10e   : > { %p503_p10 = pnand %p502_p4, %p846_p9 }
 0x10f   : > { %p508_p5 = por %p507_p2, %p506_p1 }
 0x110   : > { %p504_p12 = pneg %p503_p10 }
 0x111   : > { %p510_p11 = por %p509_p8, %p508_p5 }
 0x113   : > { %p511_p0 = pnand %p510_p11, %p504_p12 }
 0x115   : > { %514 = shalt.err (!%p511_p0)
}
 0x116   : > { %392 = dma.vmem_to_hbm [thread:$0]  (%p846_p9), %s755_s4, 128, %s753_s16, %s228_s19  }
 0x117   : > { %s389_s20 = spop %388  ;;  %s786_s27 = scalar_lea.hbm %s837_s2, %s382_s21 }
 0x118   : > { %v225_v17 = vstv %s389_s20  ;;  %s233_s3 = scalar_lea.sflag [#allocation9], %s732_s28  ;;  %s515_s5 = scalar_lea.vmem %s757_s7, 128 }
 0x119   : > { %226 = vst [vmem:[%s184_s6] sm:$0xff] %v225_v17  ;;  %p516_p7 = scmp.ne.s32.totalorder %s757_s7, %s515_s5  ;;  %s605_s30 = smov [#allocation8]  }
 0x11a   : > { %s519_s8 = sshll.u32 %s605_s30, 4  ;;  %s520_s8 = int_to_ptr.vmem [resolvable:$false] %s519_s8 }
 0x11b   : > { %p517_p13 = pnand %p516_p7, %p846_p9  ;;  %s521_s4 = scalar_lea.vmem %s520_s8, 256 }
 0x11c   : > { %p522_p6 = scmp.lt.s32.totalorder %s757_s7, %s520_s8  ;;  %p523_p4 = scmp.lt.s32.totalorder %s521_s4, %s515_s5 }
 0x11d   : > { %p518_p3 = pneg %p517_p13 }
 0x11e   : > { %p524_p10 = por %p523_p4, %p522_p6 }
 0x120   : > { %p525_p12 = pnand %p524_p10, %p518_p3 }
 0x122   : > { %528 = shalt.err (!%p525_p12)
}
 0x123   : > { %s529_s12 = scalar_lea.hbm %s786_s27, 128  ;;  %s533_s21 = scalar_lea.hbm %s837_s2, 256 }
 0x124   : > { %p530_p1 = scmp.ne.s32.totalorder %s786_s27, %s529_s12  ;;  %p534_p8 = scmp.lt.u32.totalorder %s786_s27, %s837_s2 }
 0x125   : > { %p535_p11 = scmp.lt.u32.totalorder %s533_s21, %s529_s12  ;;  %p537_p7 = scmp.lt.u32.totalorder %s529_s12, %s786_s27 }
 0x126   : > { %p531_p2 = pnand %p530_p1, %p846_p9 }
 0x127   : > { %p536_p0 = por %p535_p11, %p534_p8 }
 0x128   : > { %p532_p5 = pneg %p531_p2 }
 0x129   : > { %p538_p13 = por %p537_p7, %p536_p0 }
 0x12b   : > { %p539_p3 = pnand %p538_p13, %p532_p5 }
 0x12d   : > { %542 = shalt.err (!%p539_p3)
}
 0x12e   : > { %393 = dma.vmem_to_hbm [thread:$0]  (%p846_p9), %s757_s7, 128, %s786_s27, %s233_s3  }
 0x12f PF: > { %s271_s19 = sand.u32 1, %s581_s9   ;;  %p847_p6 = scmp.ne.s32.totalorder %s842_s24, 0 }
 0x130   : > { %p848_p4 = scmp.ge.s32.totalorder %s601_s14, 2  ;;  %s272_s15 = scalar_lea.sflag [#allocation6], %s271_s19 }
 0x132   : > { %p401_p10 = pnand %p848_p4, %p847_p6 }
 0x134   : > { %572 = dma.done.wait (!%p401_p10), %s272_s15, 128  }
 0x135   : > { %574 = vsyncadd (!%p401_p10), %s272_s15, 4294967168  ;;  %s281_s18 = scalar_lea.sflag [#allocation9], %s271_s19 }
 0x136   : > { %576 = dma.done.wait (!%p401_p10), %s281_s18, 128  }
 0x137   : > { %578 = vsyncadd (!%p401_p10), %s281_s18, 4294967168  ;;  %s22_s14 = sadd.s32 1, %s601_s14   ;;  %s849_s9 = smov %s585_s10 }
 0x138   : > { %p19_p12 = scmp.ge.s32.totalorder %s22_s14, 4   ;;  %s850_s10 = smov %s589_s11 }
 0x139   : > { %s851_s11 = smov %s677_s23  ;;  %s852_s12 = smov %s597_s13 }
 0x13a   : > { %s853_s13 = smov %s855_s17  ;;  %21 = sbr.rel (!%p19_p12) target bundleno = 8 (0x8), region = 94 }
 0x141   :  { %286 = vsyncpa [#allocation5], 1 }
 0x142   :  { %288 = vsyncpa [#allocation5 + $0x1], 1 }
 0x143   :  { %289 = vsyncpa [#allocation6], 1 }
 0x144   :  { %291 = vsyncpa [#allocation6 + $0x1], 1 }
 0x145   :  { %292 = vsyncpa [#allocation9], 1 }
 0x146   :  { %294 = vsyncpa [#allocation9 + $0x1], 1 }

</bundles_post_ra>
